<compile_context>
chip_gen: v5e
topology: v5e:2x2
jax: 0.10.0
libtpu: 0.0.40
codegen_flags: <defaults>
</compile_context>

<pallas_src>
import jax
import jax.numpy as jnp
from jax.experimental import pallas as pl
from jax.experimental.pallas import tpu as pltpu


# ----------------------------------------------------------------------------
# Kernel 1: pairwise negative squared distances for kNN, one augmented matmul:
#   out[i, j] = 2 p_i.q_j - ||p_i||^2 - ||q_j||^2
# ----------------------------------------------------------------------------
def _pdist_kernel(p_ref, q_ref, o_ref):
    p = p_ref[0]                                    # (ti, 3)  row tile
    q = q_ref[0]                                    # (N, 3)   all columns
    p_sq = jnp.sum(p * p, axis=1, keepdims=True)    # (ti, 1)
    q_sq = jnp.sum(q * q, axis=1, keepdims=True)    # (N, 1)
    p_aug = jnp.concatenate([2.0 * p, -p_sq, jnp.ones_like(p_sq)], axis=1)  # (ti, 5)
    q_aug = jnp.concatenate([q, jnp.ones_like(q_sq), -q_sq], axis=1)        # (N, 5)
    o_ref[0] = jax.lax.dot_general(                 # (ti, N) = p_aug @ q_aug.T
        p_aug, q_aug, (((1,), (1,)), ((), ())),
        preferred_element_type=jnp.float32)


def pairwise_neg_sqdist(pts_bnd, tile=None):
    B, N, D = pts_bnd.shape
    if tile is None:
        tile = min(N, 512)                          # keep (ti, N) f32 tiles v7x-safe
    assert N % tile == 0 and tile % 8 == 0
    grid = (B, N // tile)
    return pl.pallas_call(
        _pdist_kernel,
        out_shape=jax.ShapeDtypeStruct((B, N, N), jnp.float32),
        grid_spec=pltpu.PrefetchScalarGridSpec(
            num_scalar_prefetch=0,
            grid=grid,
            in_specs=[pl.BlockSpec((1, tile, D), lambda b, i: (b, i, 0)),
                      pl.BlockSpec((1, N, D), lambda b, i: (b, 0, 0))],
            out_specs=pl.BlockSpec((1, tile, N), lambda b, i: (b, i, 0))),
        compiler_params=pltpu.CompilerParams(
            dimension_semantics=("parallel", "parallel")),
    )(pts_bnd, pts_bnd)


# ----------------------------------------------------------------------------
# Kernel 2: fused  gather -> linear_pos -> concat -> conv1x1+BN+ReLU x2
#                  -> max over k -> + x_center
# One grid step handles a (tn, k) tile of (point, neighbor) rows.
#   nbr_ref : (1, tn*k, 1) int32  global neighbor ids
#   src_ref : (1, N,  C+3) f32    gather source  [x | points]
#   ctr_ref : (1, tn, C+3) f32    this tile's centers (same array, tiled view)
# ----------------------------------------------------------------------------
def _fused_kernel(nbr_ref, src_ref, ctr_ref,
                  w1_ref, w2_ref, wc1_ref, wc2_ref, vec_ref, out_ref):
    tn = out_ref.shape[1]
    c = out_ref.shape[2]
    tnk = nbr_ref.shape[1]
    k = tnk // tn
    n_src = src_ref.shape[1]

    # ---- neighbor gather: one-hot selection matmul on the MXU -----------
    nbr_ids = nbr_ref[0]                                         # (tnk, 1) int32
    cols = jax.lax.broadcasted_iota(jnp.int32, (tnk, n_src), 1)
    nbr_oh = (cols == nbr_ids).astype(jnp.bfloat16)              # (tnk, N)
    src = src_ref[0].astype(jnp.bfloat16)                        # (N, C+3)
    gathered = jnp.dot(nbr_oh, src,
                       preferred_element_type=jnp.float32)       # (tnk, C+3)

    # ---- center "repeat over k": tiny one-hot matmul over the tile ------
    rows = jax.lax.broadcasted_iota(jnp.int32, (tnk, tn), 0)
    colt = jax.lax.broadcasted_iota(jnp.int32, (tnk, tn), 1)
    rep = (rows // k == colt).astype(jnp.bfloat16)               # (tnk, tn)
    ctr = ctr_ref[0]                                             # (tn, C+3) f32
    ctr_b = jnp.dot(rep, ctr.astype(jnp.bfloat16),
                    preferred_element_type=jnp.float32)          # (tnk, C+3)

    xd = gathered[:, :c] - ctr_b[:, :c]                          # x_nbr - x_ctr
    pdiff = gathered[:, c:] - ctr_b[:, c:]                       # pts_nbr - pts_ctr
    pos = jnp.concatenate([pdiff, ctr_b[:, c:]], axis=1)         # (tnk, 6)

    # ---- packed per-channel vectors: [b1, b2, s1, t1, s2, t2] -----------
    vecs = vec_ref[...]                                          # (6, C) f32
    b1 = vecs[0:1]
    b2 = vecs[1:2]
    s1 = vecs[2:3]
    t1 = vecs[3:4]
    s2 = vecs[4:5]
    t2 = vecs[5:6]

    # ---- linear_pos: Linear(6,C) -> ReLU -> Linear(C,C) -----------------
    h = jnp.maximum(
        jnp.dot(pos.astype(jnp.bfloat16), w1_ref[...],
                preferred_element_type=jnp.float32) + b1, 0.0)
    pe = jnp.dot(h.astype(jnp.bfloat16), w2_ref[...],
                 preferred_element_type=jnp.float32) + b2

    # ---- conv1 (2C -> C, no bias) + BN(fold) + ReLU: one K=2C matmul ----
    cat = jnp.concatenate([xd, pe], axis=1).astype(jnp.bfloat16)  # (tnk, 2C)
    z1 = jnp.dot(cat, wc1_ref[...], preferred_element_type=jnp.float32)
    y1 = jnp.maximum(z1 * s1 + t1, 0.0)

    # ---- conv2 (C -> C, no bias) + BN(fold) + ReLU ----------------------
    z2 = jnp.dot(y1.astype(jnp.bfloat16), wc2_ref[...],
                 preferred_element_type=jnp.float32)
    y2 = jnp.maximum(z2 * s2 + t2, 0.0)                           # (tnk, C) f32

    # ---- max over the k neighbors, residual add of f32 center features --
    out_ref[0] = jnp.max(y2.reshape(tn, k, c), axis=1) + ctr[:, :c]


def fused_edge_conv(nbr_ids, src, params, k, tn=None):
    B, N, Cp = src.shape
    C = Cp - 3
    if tn is None:
        tn = min(N, 256)                            # keep (tn*k, *) tiles v7x-safe
    assert N % tn == 0 and tn % 8 == 0 and (tn * k) % 8 == 0
    grid = (B, N // tn)

    w_args = [params[n] for n in ("w1", "w2", "wc1", "wc2", "vecs")]

    in_specs = [
        pl.BlockSpec((1, tn * k, 1), lambda b, n: (b, n, 0)),     # neighbor ids
        pl.BlockSpec((1, N, Cp), lambda b, n: (b, 0, 0)),         # gather source [x | pts]
        pl.BlockSpec((1, tn, Cp), lambda b, n: (b, n, 0)),        # centers / residual tile
    ] + [pl.BlockSpec(a.shape, lambda b, n: (0, 0)) for a in w_args]

    return pl.pallas_call(
        _fused_kernel,
        out_shape=jax.ShapeDtypeStruct((B, N, C), jnp.float32),
        grid_spec=pltpu.PrefetchScalarGridSpec(
            num_scalar_prefetch=0,
            grid=grid,
            in_specs=in_specs,
            out_specs=pl.BlockSpec((1, tn, C), lambda b, n: (b, n, 0))),
        compiler_params=pltpu.CompilerParams(
            dimension_semantics=("parallel", "parallel")),
    )(nbr_ids, src, src, *w_args)


# ----------------------------------------------------------------------------
# Parameter init (deterministic, synthetic); BN folded to scale/shift; biases
# and BN vectors packed into one (6, C) block; matmul weights stored bf16.
# ----------------------------------------------------------------------------
def init_params(key, C, eps=1e-5):
    ks = jax.random.split(key, 10)
    w1 = 0.1 * jax.random.normal(ks[0], (6, C), jnp.float32)
    b1 = 0.1 * jax.random.normal(ks[1], (C,), jnp.float32)
    w2 = 0.1 * jax.random.normal(ks[2], (C, C), jnp.float32)
    b2 = 0.1 * jax.random.normal(ks[3], (C,), jnp.float32)
    wc1 = 0.1 * jax.random.normal(ks[4], (2 * C, C), jnp.float32)   # rows: [x_diff | pos_enc]
    wc2 = 0.1 * jax.random.normal(ks[5], (C, C), jnp.float32)

    g1 = 1.0 + 0.1 * jax.random.normal(ks[6], (C,), jnp.float32)
    be1 = 0.1 * jax.random.normal(ks[7], (C,), jnp.float32)
    g2 = 1.0 + 0.1 * jax.random.normal(ks[8], (C,), jnp.float32)
    be2 = 0.1 * jax.random.normal(ks[9], (C,), jnp.float32)
    mean1 = jnp.zeros((C,), jnp.float32)
    var1 = jnp.ones((C,), jnp.float32)
    mean2 = jnp.zeros((C,), jnp.float32)
    var2 = jnp.ones((C,), jnp.float32)

    s1 = g1 / jnp.sqrt(var1 + eps)
    t1 = be1 - mean1 * s1
    s2 = g2 / jnp.sqrt(var2 + eps)
    t2 = be2 - mean2 * s2
    vecs = jnp.stack([b1, b2, s1, t1, s2, t2], axis=0)              # (6, C) f32

    return dict(w1=w1.astype(jnp.bfloat16), w2=w2.astype(jnp.bfloat16),
                wc1=wc1.astype(jnp.bfloat16), wc2=wc2.astype(jnp.bfloat16),
                vecs=vecs)


# ----------------------------------------------------------------------------
# Forward (matches swA.forward): x:(B,C,N), points:(B,3,N) -> (B,C,N)
# ----------------------------------------------------------------------------
def swa_forward(x_bcn, points_b3n, params, k, tn=None, ti=None):
    B, C, N = x_bcn.shape
    pts_t = jnp.transpose(points_b3n, (0, 2, 1))            # (B, N, 3)
    x_t = jnp.transpose(x_bcn, (0, 2, 1))                   # (B, N, C)

    neg_sqdist = pairwise_neg_sqdist(pts_t, tile=ti)        # (B, N, N)  Pallas kernel
    # TODO(synk): k-selection (top_k) has no clean Pallas TPU equivalent here;
    # a streaming blockwise top-k kernel would remove the (B,N,N) HBM round-trip.
    idx = jax.lax.top_k(neg_sqdist, k)[1]                   # (B, N, k) int32

    # Only small index arrays leave the kernel; the k-expanded feature tensors
    # are never materialized in HBM — gather happens inside the fused kernel.
    nbr_ids = idx.astype(jnp.int32).reshape(B, N * k, 1)
    src = jnp.concatenate([x_t, pts_t], axis=-1)            # (B, N, C+3)

    out_bnc = fused_edge_conv(nbr_ids, src, params, k, tn=tn)
    return jnp.transpose(out_bnc, (0, 2, 1))                # (B, C, N)


if __name__ == "__main__":
    B, C, N, K = 2, 32, 16, 8    # swA(in_channels=32, k=8); N points per cloud
    key = jax.random.PRNGKey(0)
    kx, kp, kw = jax.random.split(key, 3)

    x = jax.random.normal(kx, (B, C, N), jnp.float32)        # features (B, C, N)
    points = jax.random.normal(kp, (B, 3, N), jnp.float32)   # xyz coords (B, 3, N)
    params = init_params(kw, C)

    out = swa_forward(x, points, params, K)
    out = jax.block_until_ready(out)
    assert out.shape == (B, C, N) and out.dtype == jnp.float32
    assert bool(jnp.all(jnp.isfinite(out)))
    print("KERNEL_OK")
</pallas_src>

<mosaic_0001>
module attributes {stable_mosaic.version = 11 : i64} {
  func.func @_pdist_kernel(%arg0: i32, %arg1: i32, %arg2: memref<1x16x3xf32, #tpu.memory_space<vmem>>, %arg3: memref<1x16x3xf32, #tpu.memory_space<vmem>>, %arg4: memref<1x16x16xf32, #tpu.memory_space<vmem>>) attributes {dimension_semantics = [#tpu.dimension_semantics<parallel>, #tpu.dimension_semantics<parallel>], iteration_bounds = array<i64: 2, 1>, scalar_prefetch = 0 : i64, scratch_operands = 0 : i64, tpu.core_type = #tpu.core_type<tc>, window_params = [{transform_indices = @transform_0, window_bounds = array<i64: 1, 16, 3>}, {transform_indices = @transform_1, window_bounds = array<i64: 1, 16, 3>}, {transform_indices = @transform_2, window_bounds = array<i64: 1, 16, 16>}]} {
    %c0 = arith.constant 0 : index
    %c0_0 = arith.constant 0 : index
    %c0_1 = arith.constant 0 : index
    %0 = vector.load %arg2[%c0, %c0_0, %c0_1] : memref<1x16x3xf32, #tpu.memory_space<vmem>>, vector<1x16x3xf32>
    %1 = vector.shape_cast %0 : vector<1x16x3xf32> to vector<16x3xf32>
    %c0_2 = arith.constant 0 : index
    %c0_3 = arith.constant 0 : index
    %c0_4 = arith.constant 0 : index
    %2 = vector.load %arg3[%c0_2, %c0_3, %c0_4] : memref<1x16x3xf32, #tpu.memory_space<vmem>>, vector<1x16x3xf32>
    %3 = vector.shape_cast %2 : vector<1x16x3xf32> to vector<16x3xf32>
    %4 = arith.mulf %1, %1 : vector<16x3xf32>
    %cst = arith.constant dense<0.000000e+00> : vector<16xf32>
    %5 = vector.multi_reduction <add>, %4, %cst [1] : vector<16x3xf32> to vector<16xf32>
    %6 = vector.shape_cast %5 : vector<16xf32> to vector<16x1xf32>
    %7 = arith.mulf %3, %3 : vector<16x3xf32>
    %cst_5 = arith.constant dense<0.000000e+00> : vector<16xf32>
    %8 = vector.multi_reduction <add>, %7, %cst_5 [1] : vector<16x3xf32> to vector<16xf32>
    %9 = vector.shape_cast %8 : vector<16xf32> to vector<16x1xf32>
    %cst_6 = arith.constant 2.000000e+00 : f32
    %10 = vector.broadcast %cst_6 : f32 to vector<16x3xf32>
    %11 = arith.mulf %10, %1 : vector<16x3xf32>
    %cst_7 = arith.constant 0.000000e+00 : f32
    %12 = vector.broadcast %cst_7 : f32 to vector<16x1xf32>
    %13 = arith.subf %12, %6 : vector<16x1xf32>
    %cst_8 = arith.constant 1.000000e+00 : f32
    %14 = vector.broadcast %cst_8 : f32 to vector<16x1xf32>
    %15 = tpu.concatenate %11, %13, %14 in 1 : vector<16x3xf32>, vector<16x1xf32>, vector<16x1xf32> -> vector<16x5xf32>
    %cst_9 = arith.constant 1.000000e+00 : f32
    %16 = vector.broadcast %cst_9 : f32 to vector<16x1xf32>
    %cst_10 = arith.constant 0.000000e+00 : f32
    %17 = vector.broadcast %cst_10 : f32 to vector<16x1xf32>
    %18 = arith.subf %17, %9 : vector<16x1xf32>
    %19 = tpu.concatenate %3, %16, %18 in 1 : vector<16x3xf32>, vector<16x1xf32>, vector<16x1xf32> -> vector<16x5xf32>
    %cst_11 = arith.constant dense<0.000000e+00> : vector<16x16xf32>
    %20 = tpu.matmul %15, %19, %cst_11 {dimension_numbers = #tpu.dot_dimension_numbers<[1], [1], [0], [0], [0, 0, 1, 0], [], []>} : vector<16x5xf32>, vector<16x5xf32>, vector<16x16xf32> -> vector<16x16xf32>
    %c0_12 = arith.constant 0 : index
    %c0_13 = arith.constant 0 : index
    %c0_14 = arith.constant 0 : index
    %21 = vector.load %arg4[%c0_12, %c0_13, %c0_14] : memref<1x16x16xf32, #tpu.memory_space<vmem>>, vector<1x16x16xf32>
    %22 = vector.shape_cast %21 : vector<1x16x16xf32> to vector<16x16xf32>
    %23 = vector.shape_cast %20 : vector<16x16xf32> to vector<1x16x16xf32>
    tpu.vector_store %arg4[%c0_12, %c0_13, %c0_14], %23 {strides = array<i32>} : memref<1x16x16xf32, #tpu.memory_space<vmem>>, vector<1x16x16xf32>,
    return
  }
  func.func @transform_0(%arg0: i32, %arg1: i32) -> (i32, i32, i32) {
    %c0_i32 = arith.constant 0 : i32
    %c0_i32_0 = arith.constant 0 : i32
    return %arg0, %arg1, %c0_i32 : i32, i32, i32
  }
  func.func @transform_1(%arg0: i32, %arg1: i32) -> (i32, i32, i32) {
    %c0_i32 = arith.constant 0 : i32
    %c0_i32_0 = arith.constant 0 : i32
    %c0_i32_1 = arith.constant 0 : i32
    return %arg0, %c0_i32, %c0_i32_0 : i32, i32, i32
  }
  func.func @transform_2(%arg0: i32, %arg1: i32) -> (i32, i32, i32) {
    %c0_i32 = arith.constant 0 : i32
    %c0_i32_0 = arith.constant 0 : i32
    return %arg0, %arg1, %c0_i32 : i32, i32, i32
  }
}

</mosaic_0001>

<bundles_post_ra>
// kernel: tpu_custom_call.1
= control target key start
LH: loop header
LB: loop body
LE: loop exit
PB: predicated region body
PF: predicated region fallthrough
CT: control target
= control target key end

     0   :  { %7 = vsyncpa [#allocation3], 0  ;;  %s673_s0 = inlined_call_operand.vmem [shape: f32[2,16,3], index: 0, kind: input, shape index: {}]   ;;  %s674_s1 = inlined_call_operand.vmem [shape: f32[2,16,3], index: 1, kind: input, shape index: {}]   ;;  %s675_s2 = inlined_call_operand.hbm [shape: f32[2,16,16], index: 2, kind: output, shape index: {}]  }
   0x1   :  { %9 = vsyncpa [#allocation3 + $0x1], 0  ;;  %s555_s9 = smov 0   ;;  %s557_s10 = smov 0  }
   0x2   :  { %s559_s11 = smov 0   ;;  %s561_s12 = smov 0  }
   0x3   :  { %s563_s13 = smov 0   ;;  %s565_s14 = smov 0  }
   0x4 LB: > { %s377_s15 = sadd.s32 4294967295, %s536_s14   ;;  %s378_s16 = sadd.s32 4294967294, %s536_s14   ;;  %s536_s14 = sphi %s565_s14, %s15_s14   ;;  %s532_s13 = sphi %s563_s13, %s682_s13   ;;  %s528_s12 = sphi %s561_s12, %s681_s12   ;;  %s524_s11 = sphi %s559_s11, %s680_s11   ;;  %s520_s10 = sphi %s557_s10, %s679_s10   ;;  %s516_s9 = sphi %s555_s9, %s678_s9  }
   0x5   : > { %s27_s17 = sadd.s32 1, %s532_s13  ;;  %s90_s18 = sadd.s32 1, %s524_s11 }
   0x6   : > { %p29_p0 = scmp.ge.s32.totalorder %s27_s17, 2  ;;  %p100_p1 = scmp.ne.s32.totalorder %s524_s11, %s520_s10 }
   0x7   : > { %p101_p2 = scmp.eq.s32.totalorder %s377_s15, 1  ;;  %p106_p3 = scmp.ne.s32.totalorder %s520_s10, %s516_s9 }
   0x8   : > { %s684_s17 = smov (%p29_p0, %s27_s17), 0  ;;  %p107_p5 = scmp.eq.s32.totalorder %s378_s16, 1 }
   0x9   : > { %p595_p4 = por %p101_p2, %p100_p1  ;;  %s85_s20 = ssub.s32 %s532_s13, %s684_s17 }
   0xa   : > { %p381_p6 = scmp.ge.s32.totalorder %s536_s14, 1  ;;  %p88_p7 = scmp.eq.s32.totalorder %s85_s20, 0 }
   0xb   : > { %p602_p8 = por %p107_p5, %p106_p3  ;;  %p146_p9 = scmp.lt.s32.totalorder %s536_s14, 3 }
   0xc   : > { %s608_s22 = scalar_select %p88_p7, %s524_s11, %s90_s18  }
   0xd   : > { %p147_p10 = pnand %p381_p6, %p146_p9 }
   0xe   : > { %p178_p11 = scmp.lt.s32.totalorder (!%p147_p10), %s528_s12, 1  ;;  %s174_s3 = sand.u32 (!%p147_p10), 1, %s520_s10  }
   0xf   : > { %150 = sbr.rel (%p147_p10) target bundleno = 289 (0x121), region = 28  ;;  %s382_s4 = sshll.u32 (!%p147_p10), %s174_s3, 4 }
  0x10   : > { %s398_s5 = sshll.u32 (!%p147_p10), %s528_s12, 4  ;;  %s176_s15 = scalar_lea.vmem (!%p147_p10), [#allocation2], %s382_s4 }
  0x11   : > { %s282_s8 = scalar_lea.hbm (!%p147_p10), %s675_s2, %s398_s5  ;;  %s283_s16 = sshll.u32 (!%p147_p10), %s176_s15, 4  ;;  %s284_s16 = int_to_ptr.vmem [resolvable:$true] %s283_s16 }
  0x12   : > { %s285_s18 = sshll.u32 (!%p147_p10), %s282_s8, 4  ;;  %s269_s20 = scalar_lea.sflag (!%p147_p10), [#allocation3], %s174_s3  ;;  %s286_s18 = int_to_ptr.hbm [resolvable:$true] %s285_s18 }
  0x13   : > { %s478_s26 = scalar_lea.hbm (!%p147_p10), %s675_s2, 32 }
  0x14   : > { %s179_s23 = scalar_select %p178_p11, %s528_s12, 1  ;;  %vm199_vm0 = vcmask 23552   ;;  %vm220_vm1 = vcmask 31744   ;;  %vm229_vm2 = vcmask 39936   ;;  %vm265_vm3 = vcmask 130048  }
  0x16   : > { %s396_s24 = sshll.u32 %s179_s23, 4  ;;  %s472_s23 = sshra.s32 %s286_s18, 4  ;;  %s473_s23 = int_to_ptr.hbm [resolvable:$true] %s472_s23 }
  0x17   : > { %s191_s27 = scalar_lea.vmem %s674_s1, %s396_s24  ;;  %s185_s30 = scalar_lea.vmem %s673_s0, %s396_s24 }
  0x18   : > { %v196_v0 = vld [vmem:[%s191_s27 + $0x8] sm:$0xff]  ;;  %v193_v1 = vld [vmem:[%s185_s30] sm:$0xff]  ;;  %s474_s24 = scalar_lea.hbm %s473_s23, 16  ;;  %p479_p1 = scmp.lt.s32.totalorder %s473_s23, %s675_s2 }
  0x19   : > { %v207_v2 = vmul.f32 %v196_v0, %v196_v0  ;;  %v197_v3 = vmul.f32 %v193_v1, %v193_v1  ;;  %v195_v4 = vld [vmem:[%s191_s27] sm:$0xff]  ;;  %v194_v5 = vld [vmem:[%s185_s30 + $0x8] sm:$0xff]  ;;  %v226_v14 = vsel %vm199_vm0, %v196_v0, 1.0  ;;  %v214_v17 = vmul.f32 2.0, %v193_v1  ;;  %p475_p12 = scmp.ne.s32.totalorder %s473_s23, %s474_s24  ;;  %p480_p2 = scmp.lt.s32.totalorder %s478_s26, %s474_s24 }
  0x1a   : > { %v206_v8 = vmul.f32 %v195_v4, %v195_v4  ;;  %v198_v9 = vmul.f32 %v194_v5, %v194_v5  ;;  %v215_v18 = vmul.f32 2.0, %v194_v5  ;;  %v225_v22 = vsel %vm199_vm0, %v195_v4, 1.0 }
  0x1b   : > { %v211_v6 = vsel %vm199_vm0, %v207_v2, 0.0  ;;  %v200_v7 = vsel %vm199_vm0, %v197_v3, 0.0  ;;  %p476_p13 = pnand %p475_p12, %p595_p4  ;;  %p481_p3 = por %p480_p2, %p479_p1 }
  0x1c   : > { %212 = vadd.xlane.f32.xlu0 %v211_v6  ;;  %201 = vadd.xlane.f32.xlu1 %v200_v7  ;;  %v208_v10 = vsel %vm199_vm0, %v206_v8, 0.0  ;;  %v203_v11 = vsel %vm199_vm0, %v198_v9, 0.0 }
  0x1d   : > { %p477_p0 = pneg %p476_p13 }
  0x1f   : > { %p482_p5 = pnand %p481_p3, %p477_p0 }
  0x24   : > { %209 = vadd.xlane.f32.xlu0 %v208_v10  ;;  %204 = vadd.xlane.f32.xlu1 %v203_v11 }
  0x8f   : > { %v213_v12 = vpop.xlane.xlu0 %212  ;;  %v202_v13 = vpop.xlane.xlu1 %201 }
  0x90   : > { %v224_v15 = vsub.f32 0.0, %v213_v12  ;;  %v216_v19 = vsub.f32 0.0, %v202_v13 }
  0x92   : > { %v228_v16 = vsel %vm220_vm1, %v226_v14, %v224_v15  ;;  %v218_v26 = vsel %vm199_vm0, %v214_v17, %v216_v19 }
  0x93   : > { %387 = vmatpush.xpose.msk.msra.mxu0 %vm229_vm2, %v228_v16  ;;  %399 = vmatpush.xpose.msk.msra.mxu1 %vm229_vm2, %v228_v16  ;;  %v221_v29 = vsel %vm220_vm1, %v218_v26, 1.0 }
  0x97   : > { %v210_v20 = vpop.xlane.xlu0 %209  ;;  %v205_v21 = vpop.xlane.xlu1 %204 }
  0x98   : > { %v223_v23 = vsub.f32 0.0, %v210_v20  ;;  %v217_v24 = vsub.f32 0.0, %v205_v21 }
  0x9a   : > { %v227_v25 = vsel %vm220_vm1, %v225_v22, %v223_v23  ;;  %v219_v27 = vsel %vm199_vm0, %v215_v18, %v217_v24 }
  0x9b   : > { %388 = vmatpush.xpose.msk.msra.mxu0 %vm229_vm2, %v227_v25  ;;  %400 = vmatpush.xpose.msk.msra.mxu1 %vm229_vm2, %v227_v25  ;;  %v222_v28 = vsel %vm220_vm1, %v219_v27, 1.0 }
  0x9e   : > { %389 = vmatmul.msk.f32.vlgmr.msra.gmra.mxu0 %vm229_vm2, %v221_v29  ;;  %390 = vmatmul.msk.f32.vlgmr.msra.gmra.mxu1 %vm229_vm2, %v222_v28 }
 0x11b   : > { %v259_v30 = vpop.f32.mrf.mxu0  ;;  %v262_v31 = vpop.f32.mrf.mxu1 }
 0x11c   : > { %266 = vst.msk [vmem:[%s176_s15] sm:$0xff] %vm265_vm3, %v259_v30 }
 0x11d   : > { %267 = vst.msk [vmem:[%s176_s15 + $0x8] sm:$0xff] %vm265_vm3, %v262_v31 }
 0x11e   : > { %485 = shalt.err (!%p482_p5)
}
 0x11f   : > { %s538_s29 = smov 128   ;;  %s539_s30 = smov 8  }
 0x120   : > { %401 = dma.vmem_to_hbm [thread:$0]  (%p595_p4), %s284_s16, 256, %s286_s18, %s269_s20, %s538_s29, %s538_s29, %s539_s30  }
 0x121 PF: > { %p407_p6 = scmp.ge.s32.totalorder %s536_s14, 2  ;;  %s300_s3 = sand.u32 1, %s516_s9  }
 0x122   : > { %s301_s4 = scalar_lea.sflag [#allocation3], %s300_s3 }
 0x123   : > { %p404_p7 = pnand %p407_p6, %p602_p8 }
 0x125   : > { %p405_p9 = pneg %p404_p7 }
 0x127   : > { %511 = dma.done.wait (%p405_p9), %s301_s4, 256  }
 0x128   : > { %513 = vsyncadd (%p405_p9), %s301_s4, 4294967040  ;;  %s15_s14 = sadd.s32 1, %s536_s14   ;;  %s678_s9 = smov %s520_s10 }
 0x129   : > { %p12_p10 = scmp.ge.s32.totalorder %s15_s14, 4   ;;  %s679_s10 = smov %s524_s11 }
 0x12a   : > { %s680_s11 = smov %s608_s22  ;;  %s681_s12 = smov %s532_s13 }
 0x12b   : > { %s682_s13 = smov %s684_s17  ;;  %14 = sbr.rel (!%p12_p10) target bundleno = 4 (0x4), region = 66 }
 0x130   :  { %307 = vsyncpa [#allocation3], 1 }
 0x131   :  { %309 = vsyncpa [#allocation3 + $0x1], 1 }

</bundles_post_ra>
